<compile_context>
chip_gen: v7x
topology: tpu7x:2x2x1
jax: 0.10.0
libtpu: 0.0.40
codegen_flags: <defaults>
</compile_context>

<pallas_src>
import jax
import jax.numpy as jnp
from jax import lax
from jax.experimental import pallas as pl
from jax.experimental.pallas import tpu as pltpu


def _lse_kernel(coords_t_ref, ctile_ref, feats_ref, idx_ref, dist_ref,
                wc_ref, wn_ref, wd_ref, shift_ref, out_ref):
    # shapes (per grid step):
    #   coords_t_ref (1, 3, N)   full per-batch coords, channel-major
    #   ctile_ref    (1, TN, 3)  row tile of coords (points-major)
    #   feats_ref    (1, d, N)   full per-batch features, channel-major
    #   idx_ref      (1, 1, TN*K) int32 flattened neighbor indices (row tile)
    #   dist_ref     (1, 1, TN*K) f32 flattened neighbor distances (row tile)
    #   wc/wn        (d, 3)  folded spatial weights (BN scale folded in)
    #   wd/shift     (d, 1)
    #   out_ref      (1, 2d, TN*K)
    _, d, N = feats_ref.shape
    _, TN, _ = ctile_ref.shape
    TNK = idx_ref.shape[2]
    K = TNK // TN

    coords_t = coords_t_ref[0]                                   # (3, N)
    ctile = ctile_ref[0]                                          # (TN, 3)
    feats = feats_ref[0]                                          # (d, N)
    idx_row = idx_ref[0]                                          # (1, TNK)
    dist_row = dist_ref[0]                                        # (1, TNK)

    # --- tiny spatial projections (scale already folded into weights) -----
    neigh_proj = jnp.dot(wn_ref[...], coords_t,
                         preferred_element_type=jnp.float32)      # (d, N)
    center_proj = lax.dot_general(                                # (d, TN)
        wc_ref[...], ctile, (((1,), (1,)), ((), ())),
        preferred_element_type=jnp.float32)

    # --- single 2d-wide one-hot gather on the MXU (contraction dim = N) ---
    src = jnp.concatenate([neigh_proj, feats], axis=0)            # (2d, N)
    iota = lax.broadcasted_iota(jnp.int32, (N, TNK), 0)           # (N, TNK)
    onehot = (iota == idx_row).astype(jnp.float32)                # (N, TNK)
    gathered = jnp.dot(src, onehot,
                       preferred_element_type=jnp.float32)        # (2d, TNK)

    # --- center broadcast + rank-1 dist term + shift, ReLU (VPU only) -----
    center_b = jnp.broadcast_to(center_proj[:, :, None],
                                (d, TN, K)).reshape(d, TNK)       # (d, TNK)
    h = gathered[:d, :] + center_b + wd_ref[...] * dist_row + shift_ref[...]
    h = jnp.maximum(h, 0.0)

    # --- two lane-dense slab writes (no lane concat / interleave) ---------
    out_ref[0, :d, :] = h.astype(out_ref.dtype)
    out_ref[0, d:, :] = gathered[d:, :].astype(out_ref.dtype)


def local_spatial_encoding(coords, features, idx, dist,
                           conv_w, conv_b, bn_gamma, bn_beta,
                           bn_mean, bn_var, eps=1e-6, tile_n=None):
    """coords (B,N,3), features (B,d,N,1), idx (B,N,K) int32, dist (B,N,K).
    Returns (B, 2*d, N, K) matching the PyTorch module (eval-mode BN)."""
    B, N, _ = coords.shape
    d = features.shape[1]
    K = idx.shape[2]

    TN = N if tile_n is None else tile_n
    assert N % TN == 0
    # (8,128) block constraints for the tiled specs
    assert TN == N or TN % 8 == 0
    assert TN == N or (TN * K) % 128 == 0
    TNK = TN * K

    coords = coords.astype(jnp.float32)
    coords_t = jnp.transpose(coords, (0, 2, 1))                   # (B,3,N) tiny
    feats_t = features[..., 0].astype(jnp.float32)                # (B,d,N) no transpose
    idx_r = idx.astype(jnp.int32).reshape(B, 1, N * K)
    dist_r = dist.astype(jnp.float32).reshape(B, 1, N * K)

    # fold conv bias + eval-mode BN into the weights:
    #   h = (w_c+w_r)*scale · center + (w_n-w_r)*scale · neigh
    #       + w_d*scale * dist + [beta + (b - mean)*scale]
    w = conv_w.astype(jnp.float32)                                # (d, 10)
    scale = (bn_gamma / jnp.sqrt(bn_var + eps)).astype(jnp.float32)
    wc = (w[:, 0:3] + w[:, 6:9]) * scale[:, None]                 # (d, 3)
    wn = (w[:, 3:6] - w[:, 6:9]) * scale[:, None]                 # (d, 3)
    wd = (w[:, 9] * scale).reshape(d, 1)                          # (d, 1)
    shift = (bn_beta.astype(jnp.float32)
             + (conv_b.astype(jnp.float32) - bn_mean.astype(jnp.float32))
             * scale).reshape(d, 1)                               # (d, 1)

    out = pl.pallas_call(
        _lse_kernel,
        out_shape=jax.ShapeDtypeStruct((B, 2 * d, N * K), jnp.float32),
        grid_spec=pltpu.PrefetchScalarGridSpec(
            num_scalar_prefetch=0,
            grid=(B, N // TN),
            in_specs=[
                pl.BlockSpec((1, 3, N), lambda b, i: (b, 0, 0)),     # coords (chan-major, full)
                pl.BlockSpec((1, TN, 3), lambda b, i: (b, i, 0)),    # coords row tile
                pl.BlockSpec((1, d, N), lambda b, i: (b, 0, 0)),     # features (chan-major, full)
                pl.BlockSpec((1, 1, TNK), lambda b, i: (b, 0, i)),   # idx tile (flattened)
                pl.BlockSpec((1, 1, TNK), lambda b, i: (b, 0, i)),   # dist tile (flattened)
                pl.BlockSpec((d, 3), lambda b, i: (0, 0)),           # wc (folded)
                pl.BlockSpec((d, 3), lambda b, i: (0, 0)),           # wn (folded)
                pl.BlockSpec((d, 1), lambda b, i: (0, 0)),           # wd (folded)
                pl.BlockSpec((d, 1), lambda b, i: (0, 0)),           # shift
            ],
            out_specs=pl.BlockSpec((1, 2 * d, TNK), lambda b, i: (b, 0, i)),
        ),
        compiler_params=pltpu.CompilerParams(
            dimension_semantics=("parallel", "parallel"),
            vmem_limit_bytes=32 * 1024 * 1024,   # safe on v5e/v6e/v7x
        ),
    )(coords_t, coords, feats_t, idx_r, dist_r, wc, wn, wd, shift)

    # free (contiguous) reshape back to the PyTorch NCHW layout (B, 2d, N, K)
    return out.reshape(B, 2 * d, N, K)


def _reference(coords, features, idx, dist, conv_w, conv_b,
               bn_gamma, bn_beta, bn_mean, bn_var, eps=1e-6):
    """Plain-JAX reference of the PyTorch forward (eval-mode BN)."""
    feats_nd = jnp.transpose(features[..., 0], (0, 2, 1))         # (B, N, d)
    scale = bn_gamma / jnp.sqrt(bn_var + eps)
    shift = bn_beta + (conv_b - bn_mean) * scale
    w_k = conv_w.T                                                # (10, d)

    def one(c, f, i, dd):
        neigh_c = c[i]                                            # (N, K, 3)
        center = jnp.broadcast_to(c[:, None, :], neigh_c.shape)
        rel = center - neigh_c
        cat10 = jnp.concatenate([center, neigh_c, rel, dd[..., None]], axis=-1)
        h = jnp.maximum(cat10 @ w_k * scale + shift, 0.0)         # (N, K, d)
        nf = f[i]                                                 # (N, K, d)
        return jnp.concatenate([h, nf], axis=-1)                  # (N, K, 2d)

    out = jax.vmap(one)(coords, feats_nd, idx, dist)
    return jnp.transpose(out, (0, 3, 1, 2))


if __name__ == "__main__":
    B, N, K, d = 2, 64, 16, 8
    TN = 32  # row tile: TN % 8 == 0 and TN*K % 128 == 0

    key = jax.random.PRNGKey(0)
    kc, kf, ki, kd, kw, kb, kg, kbe = jax.random.split(key, 8)

    coords = jax.random.normal(kc, (B, N, 3), dtype=jnp.float32)
    features = jax.random.normal(kf, (B, d, N, 1), dtype=jnp.float32)
    idx = jax.random.randint(ki, (B, N, K), 0, N, dtype=jnp.int32)
    dist = jax.random.uniform(kd, (B, N, K), dtype=jnp.float32)

    # deterministic synthetic parameters (SharedMLP(10, d, bn=True, ReLU))
    conv_w = 0.1 * jax.random.normal(kw, (d, 10), dtype=jnp.float32)   # (out,in)
    conv_b = 0.1 * jax.random.normal(kb, (d,), dtype=jnp.float32)
    bn_gamma = 1.0 + 0.05 * jax.random.normal(kg, (d,), dtype=jnp.float32)
    bn_beta = 0.05 * jax.random.normal(kbe, (d,), dtype=jnp.float32)
    bn_mean = jnp.zeros((d,), jnp.float32)
    bn_var = jnp.ones((d,), jnp.float32)

    out = local_spatial_encoding(coords, features, idx, dist,
                                 conv_w, conv_b, bn_gamma, bn_beta,
                                 bn_mean, bn_var, tile_n=TN)
    out = jax.block_until_ready(out)

    ref = _reference(coords, features, idx, dist, conv_w, conv_b,
                     bn_gamma, bn_beta, bn_mean, bn_var)

    assert out.shape == (B, 2 * d, N, K), out.shape
    err = float(jnp.max(jnp.abs(out - ref)))
    assert jnp.allclose(out, ref, atol=1e-4, rtol=1e-4), err

    print("KERNEL_OK")
</pallas_src>

<mosaic_0001>
module attributes {stable_mosaic.version = 11 : i64} {
  func.func @_lse_kernel(%arg0: i32, %arg1: i32, %arg2: memref<1x3x64xf32, #tpu.memory_space<vmem>>, %arg3: memref<1x32x3xf32, #tpu.memory_space<vmem>>, %arg4: memref<1x8x64xf32, #tpu.memory_space<vmem>>, %arg5: memref<1x1x512xi32, #tpu.memory_space<vmem>>, %arg6: memref<1x1x512xf32, #tpu.memory_space<vmem>>, %arg7: memref<8x3xf32, #tpu.memory_space<vmem>>, %arg8: memref<8x3xf32, #tpu.memory_space<vmem>>, %arg9: memref<8x1xf32, #tpu.memory_space<vmem>>, %arg10: memref<8x1xf32, #tpu.memory_space<vmem>>, %arg11: memref<1x16x512xf32, #tpu.memory_space<vmem>>) attributes {dimension_semantics = [#tpu.dimension_semantics<parallel>, #tpu.dimension_semantics<parallel>], iteration_bounds = array<i64: 2, 2>, scalar_prefetch = 0 : i64, scratch_operands = 0 : i64, tpu.core_type = #tpu.core_type<tc>, window_params = [{transform_indices = @transform_0, window_bounds = array<i64: 1, 3, 64>}, {transform_indices = @transform_1, window_bounds = array<i64: 1, 32, 3>}, {transform_indices = @transform_2, window_bounds = array<i64: 1, 8, 64>}, {transform_indices = @transform_3, window_bounds = array<i64: 1, 1, 512>}, {transform_indices = @transform_4, window_bounds = array<i64: 1, 1, 512>}, {pipeline_mode = #tpu.pipeline_mode<synchronous>, transform_indices = @transform_5, window_bounds = array<i64: 8, 3>}, {pipeline_mode = #tpu.pipeline_mode<synchronous>, transform_indices = @transform_6, window_bounds = array<i64: 8, 3>}, {pipeline_mode = #tpu.pipeline_mode<synchronous>, transform_indices = @transform_7, window_bounds = array<i64: 8, 1>}, {pipeline_mode = #tpu.pipeline_mode<synchronous>, transform_indices = @transform_8, window_bounds = array<i64: 8, 1>}, {transform_indices = @transform_9, window_bounds = array<i64: 1, 16, 512>}]} {
    %c0 = arith.constant 0 : index
    %c0_0 = arith.constant 0 : index
    %c0_1 = arith.constant 0 : index
    %0 = vector.load %arg2[%c0, %c0_0, %c0_1] : memref<1x3x64xf32, #tpu.memory_space<vmem>>, vector<1x3x64xf32>
    %1 = vector.shape_cast %0 : vector<1x3x64xf32> to vector<3x64xf32>
    %c0_2 = arith.constant 0 : index
    %c0_3 = arith.constant 0 : index
    %c0_4 = arith.constant 0 : index
    %2 = vector.load %arg3[%c0_2, %c0_3, %c0_4] : memref<1x32x3xf32, #tpu.memory_space<vmem>>, vector<1x32x3xf32>
    %3 = vector.shape_cast %2 : vector<1x32x3xf32> to vector<32x3xf32>
    %c0_5 = arith.constant 0 : index
    %c0_6 = arith.constant 0 : index
    %c0_7 = arith.constant 0 : index
    %4 = vector.load %arg4[%c0_5, %c0_6, %c0_7] : memref<1x8x64xf32, #tpu.memory_space<vmem>>, vector<1x8x64xf32>
    %5 = vector.shape_cast %4 : vector<1x8x64xf32> to vector<8x64xf32>
    %c0_8 = arith.constant 0 : index
    %c0_9 = arith.constant 0 : index
    %c0_10 = arith.constant 0 : index
    %6 = vector.load %arg5[%c0_8, %c0_9, %c0_10] : memref<1x1x512xi32, #tpu.memory_space<vmem>>, vector<1x1x512xi32>
    %7 = vector.shape_cast %6 : vector<1x1x512xi32> to vector<1x512xi32>
    %c0_11 = arith.constant 0 : index
    %c0_12 = arith.constant 0 : index
    %c0_13 = arith.constant 0 : index
    %8 = vector.load %arg6[%c0_11, %c0_12, %c0_13] : memref<1x1x512xf32, #tpu.memory_space<vmem>>, vector<1x1x512xf32>
    %9 = vector.shape_cast %8 : vector<1x1x512xf32> to vector<1x512xf32>
    %c0_14 = arith.constant 0 : index
    %c0_15 = arith.constant 0 : index
    %10 = vector.load %arg8[%c0_14, %c0_15] : memref<8x3xf32, #tpu.memory_space<vmem>>, vector<8x3xf32>
    %cst = arith.constant dense<0.000000e+00> : vector<8x64xf32>
    %11 = tpu.matmul %10, %1, %cst {dimension_numbers = #tpu.dot_dimension_numbers<[1], [0], [0], [1], [0, 0, 1, 1], [], []>} : vector<8x3xf32>, vector<3x64xf32>, vector<8x64xf32> -> vector<8x64xf32>
    %c0_16 = arith.constant 0 : index
    %c0_17 = arith.constant 0 : index
    %12 = vector.load %arg7[%c0_16, %c0_17] : memref<8x3xf32, #tpu.memory_space<vmem>>, vector<8x3xf32>
    %cst_18 = arith.constant dense<0.000000e+00> : vector<8x32xf32>
    %13 = tpu.matmul %12, %3, %cst_18 {dimension_numbers = #tpu.dot_dimension_numbers<[1], [1], [0], [0], [0, 0, 1, 0], [], []>} : vector<8x3xf32>, vector<32x3xf32>, vector<8x32xf32> -> vector<8x32xf32>
    %14 = tpu.concatenate %11, %5 in 0 : vector<8x64xf32>, vector<8x64xf32> -> vector<16x64xf32>
    %15 = tpu.iota {dimensions = array<i32: 0>} : vector<64x512xi32>
    %16 = vector.broadcast %7 : vector<1x512xi32> to vector<64x512xi32>
    %17 = arith.cmpi eq, %15, %16 : vector<64x512xi32>
    %18 = arith.extui %17 : vector<64x512xi1> to vector<64x512xi32>
    %19 = arith.sitofp %18 : vector<64x512xi32> to vector<64x512xf32>
    %cst_19 = arith.constant dense<0.000000e+00> : vector<16x512xf32>
    %20 = tpu.matmul %14, %19, %cst_19 {dimension_numbers = #tpu.dot_dimension_numbers<[1], [0], [0], [1], [0, 0, 1, 1], [], []>} : vector<16x64xf32>, vector<64x512xf32>, vector<16x512xf32> -> vector<16x512xf32>
    %21 = vector.shape_cast %13 : vector<8x32xf32> to vector<8x32x1xf32>
    %22 = vector.shape_cast %21 : vector<8x32x1xf32> to vector<8x32x1xf32>
    %23 = vector.broadcast %22 : vector<8x32x1xf32> to vector<8x32x16xf32>
    %24 = vector.shape_cast %23 : vector<8x32x16xf32> to vector<8x512xf32>
    %25 = vector.extract_strided_slice %20 {offsets = [0, 0], sizes = [8, 512], strides = [1, 1]} : vector<16x512xf32> to vector<8x512xf32>
    %26 = arith.addf %25, %24 : vector<8x512xf32>
    %c0_20 = arith.constant 0 : index
    %c0_21 = arith.constant 0 : index
    %27 = vector.load %arg9[%c0_20, %c0_21] : memref<8x1xf32, #tpu.memory_space<vmem>>, vector<8x1xf32>
    %28 = vector.broadcast %27 : vector<8x1xf32> to vector<8x512xf32>
    %29 = vector.broadcast %9 : vector<1x512xf32> to vector<8x512xf32>
    %30 = arith.mulf %28, %29 : vector<8x512xf32>
    %31 = arith.addf %26, %30 : vector<8x512xf32>
    %c0_22 = arith.constant 0 : index
    %c0_23 = arith.constant 0 : index
    %32 = vector.load %arg10[%c0_22, %c0_23] : memref<8x1xf32, #tpu.memory_space<vmem>>, vector<8x1xf32>
    %33 = vector.broadcast %32 : vector<8x1xf32> to vector<8x512xf32>
    %34 = arith.addf %31, %33 : vector<8x512xf32>
    %cst_24 = arith.constant 0.000000e+00 : f32
    %35 = vector.broadcast %cst_24 : f32 to vector<8x512xf32>
    %36 = arith.maximumf %34, %35 : vector<8x512xf32>
    %c0_25 = arith.constant 0 : index
    %c0_26 = arith.constant 0 : index
    %c0_27 = arith.constant 0 : index
    %37 = vector.load %arg11[%c0_25, %c0_26, %c0_27] : memref<1x16x512xf32, #tpu.memory_space<vmem>>, vector<1x8x512xf32>
    %38 = vector.shape_cast %37 : vector<1x8x512xf32> to vector<8x512xf32>
    %39 = vector.shape_cast %36 : vector<8x512xf32> to vector<1x8x512xf32>
    tpu.vector_store %arg11[%c0_25, %c0_26, %c0_27], %39 {strides = array<i32>} : memref<1x16x512xf32, #tpu.memory_space<vmem>>, vector<1x8x512xf32>,
    %40 = vector.extract_strided_slice %20 {offsets = [8, 0], sizes = [8, 512], strides = [1, 1]} : vector<16x512xf32> to vector<8x512xf32>
    %c0_28 = arith.constant 0 : index
    %c8 = arith.constant 8 : index
    %c0_29 = arith.constant 0 : index
    %41 = vector.load %arg11[%c0_28, %c8, %c0_29] : memref<1x16x512xf32, #tpu.memory_space<vmem>>, vector<1x8x512xf32>
    %42 = vector.shape_cast %41 : vector<1x8x512xf32> to vector<8x512xf32>
    %43 = vector.shape_cast %40 : vector<8x512xf32> to vector<1x8x512xf32>
    tpu.vector_store %arg11[%c0_28, %c8, %c0_29], %43 {strides = array<i32>} : memref<1x16x512xf32, #tpu.memory_space<vmem>>, vector<1x8x512xf32>,
    return
  }
  func.func @transform_0(%arg0: i32, %arg1: i32) -> (i32, i32, i32) {
    %c0_i32 = arith.constant 0 : i32
    %c0_i32_0 = arith.constant 0 : i32
    %c0_i32_1 = arith.constant 0 : i32
    return %arg0, %c0_i32, %c0_i32_0 : i32, i32, i32
  }
  func.func @transform_1(%arg0: i32, %arg1: i32) -> (i32, i32, i32) {
    %c0_i32 = arith.constant 0 : i32
    %c0_i32_0 = arith.constant 0 : i32
    return %arg0, %arg1, %c0_i32 : i32, i32, i32
  }
  func.func @transform_2(%arg0: i32, %arg1: i32) -> (i32, i32, i32) {
    %c0_i32 = arith.constant 0 : i32
    %c0_i32_0 = arith.constant 0 : i32
    %c0_i32_1 = arith.constant 0 : i32
    return %arg0, %c0_i32, %c0_i32_0 : i32, i32, i32
  }
  func.func @transform_3(%arg0: i32, %arg1: i32) -> (i32, i32, i32) {
    %c0_i32 = arith.constant 0 : i32
    %c0_i32_0 = arith.constant 0 : i32
    return %arg0, %c0_i32, %arg1 : i32, i32, i32
  }
  func.func @transform_4(%arg0: i32, %arg1: i32) -> (i32, i32, i32) {
    %c0_i32 = arith.constant 0 : i32
    %c0_i32_0 = arith.constant 0 : i32
    return %arg0, %c0_i32, %arg1 : i32, i32, i32
  }
  func.func @transform_5(%arg0: i32, %arg1: i32) -> (i32, i32) {
    %c0_i32 = arith.constant 0 : i32
    %c0_i32_0 = arith.constant 0 : i32
    %c0_i32_1 = arith.constant 0 : i32
    return %c0_i32, %c0_i32_0 : i32, i32
  }
  func.func @transform_6(%arg0: i32, %arg1: i32) -> (i32, i32) {
    %c0_i32 = arith.constant 0 : i32
    %c0_i32_0 = arith.constant 0 : i32
    %c0_i32_1 = arith.constant 0 : i32
    return %c0_i32, %c0_i32_0 : i32, i32
  }
  func.func @transform_7(%arg0: i32, %arg1: i32) -> (i32, i32) {
    %c0_i32 = arith.constant 0 : i32
    %c0_i32_0 = arith.constant 0 : i32
    %c0_i32_1 = arith.constant 0 : i32
    return %c0_i32, %c0_i32_0 : i32, i32
  }
  func.func @transform_8(%arg0: i32, %arg1: i32) -> (i32, i32) {
    %c0_i32 = arith.constant 0 : i32
    %c0_i32_0 = arith.constant 0 : i32
    %c0_i32_1 = arith.constant 0 : i32
    return %c0_i32, %c0_i32_0 : i32, i32
  }
  func.func @transform_9(%arg0: i32, %arg1: i32) -> (i32, i32, i32) {
    %c0_i32 = arith.constant 0 : i32
    %c0_i32_0 = arith.constant 0 : i32
    return %arg0, %c0_i32, %arg1 : i32, i32, i32
  }
}

</mosaic_0001>

<bundles_post_ra>
// kernel: tpu_custom_call.1
= control target key start
LH: loop header
LB: loop body
LE: loop exit
PB: predicated region body
PF: predicated region fallthrough
CT: control target
= control target key end

     0   :  { %14 = vsyncpa [#allocation3], 0  ;;  %s3106_s0 = inlined_call_operand.vmem [shape: f32[2,3,64], index: 0, kind: input, shape index: {}]   ;;  %s3107_s1 = inlined_call_operand.vmem [shape: f32[2,64,3], index: 1, kind: input, shape index: {}]   ;;  %s3108_s2 = inlined_call_operand.vmem [shape: f32[2,8,64], index: 2, kind: input, shape index: {}]   ;;  %s3109_s3 = inlined_call_operand.vmem [shape: s32[2,1,1024], index: 3, kind: input, shape index: {}]   ;;  %s3110_s4 = inlined_call_operand.vmem [shape: f32[2,1,1024], index: 4, kind: input, shape index: {}]   ;;  %s3111_s5 = inlined_call_operand.vmem [shape: f32[8,3], index: 5, kind: input, shape index: {}]   ;;  %s3112_s6 = inlined_call_operand.vmem [shape: f32[8,3], index: 6, kind: input, shape index: {}]   ;;  %s3113_s7 = inlined_call_operand.vmem [shape: f32[8,1], index: 7, kind: input, shape index: {}]   ;;  %s3114_s8 = inlined_call_operand.vmem [shape: f32[8,1], index: 8, kind: input, shape index: {}]   ;;  %s3115_s9 = inlined_call_operand.hbm [shape: f32[2,16,1024], index: 9, kind: output, shape index: {}]  }
   0x1   :  { %16 = vsyncpa [#allocation3 + $0x1], 0  ;;  %s2390_s30 = smov 0   ;;  %s2392_s10 = smov 0  }
   0x2   :  { %s2394_s11 = smov 0   ;;  %s2396_s12 = smov 0  }
   0x3   :  { %s2398_s13 = smov 0   ;;  %s2400_s14 = smov 0  }
   0x4   :  { %s2402_s15 = smov 0   ;;  %s2404_s16 = smov 0  }
   0x5 LB: > { %3121 = sst [smem:[#allocation5_spill]] %s2313_s14  ;;  %s1972_s17 = sadd.s32 4294967295, %s2321_s16   ;;  %s2321_s16 = sphi %s2404_s16, %s22_s16   ;;  %s2317_s15 = sphi %s2402_s15, %s3145_s15   ;;  %s2313_s14 = sphi %s2400_s14, %s3144_s14   ;;  %s2309_s13 = sphi %s2398_s13, %s3143_s13   ;;  %s2305_s12 = sphi %s2396_s12, %s3142_s12   ;;  %s2301_s11 = sphi %s2394_s11, %s3148_s11   ;;  %s2297_s10 = sphi %s2392_s10, %s3147_s10   ;;  %s2293_s30 = sphi %s2390_s30, %s3146_s30  }
   0x6   : > { %3122 = sst [smem:[#allocation6_spill]] %s2317_s15  ;;  %s1973_s18 = sadd.s32 4294967294, %s2321_s16  }
   0x7   : > { %s31_s19 = sadd.s32 1, %s2313_s14  ;;  %s34_s20 = sadd.s32 1, %s2317_s15 }
   0x8   : > { %p32_p0 = scmp.ge.s32.totalorder %s31_s19, 2  ;;  %p273_p1 = scmp.ne.s32.totalorder %s2301_s11, %s2297_s10 }
   0x9   : > { %p274_p2 = scmp.eq.s32.totalorder %s1972_s17, 3  ;;  %p279_p5 = scmp.ne.s32.totalorder %s2297_s10, %s2293_s30 }
   0xa   : > { %s3150_s19 = smov (%p32_p0, %s31_s19), 0  ;;  %s3152_s20 = smov (!%p32_p0, %s34_s20), %s2317_s15 }
   0xb   : > { %3123 = sst [smem:[#allocation7_spill]] %s3150_s19  ;;  %s259_s21 = ssub.s32 %s2313_s14, %s3150_s19 }
   0xc   : > { %p2441_p3 = por %p274_p2, %p273_p1  ;;  %p36_p4 = scmp.ge.s32.totalorder %s3152_s20, 2 }
   0xd   : > { %p280_p6 = scmp.eq.s32.totalorder %s1973_s18, 3  ;;  %p1976_p7 = scmp.ge.s32.totalorder %s2321_s16, 1 }
   0xe   : > { %s3154_s20 = smov (%p36_p4, %s3152_s20), 0  ;;  %p361_p9 = scmp.lt.s32.totalorder %s2321_s16, 5 }
   0xf   : > { %3125 = sst [smem:[#allocation8_spill]] %s3154_s20  ;;  %p2450_p8 = por %p280_p6, %p279_p5 }
  0x10   : > { %s258_s24 = ssub.s32 %s2317_s15, %s3154_s20  ;;  %s263_s25 = sadd.s32 1, %s2301_s11 }
  0x11   : > { %s260_s26 = sor.u32 %s259_s21, %s258_s24  ;;  %p362_p10 = pnand %p1976_p7, %p361_p9 }
  0x12   : > { %p261_p11 = scmp.eq.s32.totalorder %s260_s26, 0  ;;  %p425_p12 = scmp.lt.s32.totalorder (!%p362_p10), %s2309_s13, 1  ;;  %v2323_v0 = vmov (!%p362_p10), 0.0|0.0   ;;  %vm2324_vm0 = vmmov (!%p362_p10), 0   ;;  %v2325_v1 = vmov (!%p362_p10), 0.0   ;;  %vm471_vm1 = vcmask (!%p362_p10), 23552  }
  0x13   : > { %365 = sbr.rel (%p362_p10) target bundleno = 640 (0x280), region = 56  ;;  %s2463_s28 = sshll.u32 (!%p362_p10), %s2305_s12, 2  ;;  %2091 = vmatprep.subr.bf16.mxu1 (!%p362_p10), %v2323_v0  ;;  %2088 = vmatprep.mubr.msk.f32.mxu1 (!%p362_p10), %vm2324_vm0, %v2325_v1  ;;  %vm2093_vm2 = vmpackc.low (!%p362_p10), %vm471_vm1, %vm471_vm1  ;;  %vm475_vm3 = vcmask (!%p362_p10), 1042432   ;;  %v470_v5 = vld [vmem:[%s3112_s6] sm:$0xff] (!%p362_p10)  ;;  %v635_v11 = vlaneseq (!%p362_p10)  ;;  %v2326_v28 = vmov (!%p362_p10), 1.0|1.0  }
  0x14   : > { %s2459_s27 = scalar_select %p261_p11, %s2301_s11, %s263_s25  }
  0x15   : > { %p432_p13 = scmp.lt.s32.totalorder (!%p362_p10), %s2463_s28, 7  ;;  %2075 = vmatprep.subr.mxu0 (!%p362_p10), %v2325_v1  ;;  %2077 = vmatprep.mubr.msk.f32.mxu0 (!%p362_p10), %vm2324_vm0, %v2325_v1  ;;  %v549_v10 = vld [vmem:[%s3111_s5] sm:$0xff] (!%p362_p10)  ;;  %v2502_v12 = vshrl.u32 (!%p362_p10), %v635_v11, 7  ;;  %v2327_v44 = vmov (!%p362_p10), 0   ;;  %v2328_v61 = vmov (!%p362_p10), 1983009808  }
  0x16   : > { %2226 = vset.pattern.permute.xlu0 (!%p362_p10), %v2327_v44  ;;  %v1763_v51 = vld [vmem:[%s3113_s7] sm:$0xff] (!%p362_p10)  ;;  %v1072_v62 = vunpack.c.l.s4 (!%p362_p10), %v2328_v61  ;;  %s2330_s14 = smov (!%p362_p10), 16   ;;  %s2331_s19 = smov (!%p362_p10), 32  }
  0x17   : > { %v2505_v14 = vsub.s32 (!%p362_p10), 0, %v2502_v12  ;;  %v2508_v15 = vsub.s32 (!%p362_p10), 1, %v2502_v12  ;;  %v2513_v18 = vsub.s32 (!%p362_p10), 2, %v2502_v12  ;;  %v2516_v19 = vsub.s32 (!%p362_p10), 3, %v2502_v12  ;;  %v1798_v52 = vld [vmem:[%s3114_s8] sm:$0xff] (!%p362_p10)  ;;  %s422_s24 = sand.u32 (!%p362_p10), 1, %s2297_s10  }
  0x18   : > { %v637_v20 = vadd.s32 (!%p362_p10), 8, %v2502_v12  ;;  %v638_v21 = vadd.s32 (!%p362_p10), 16, %v2502_v12  ;;  %v639_v22 = vadd.s32 (!%p362_p10), 24, %v2502_v12  ;;  %v2524_v23 = vadd.s32 (!%p362_p10), 32, %v2502_v12  ;;  %s1977_s25 = sshll.u32 (!%p362_p10), %s422_s24, 6 }
  0x19   : > { %v2527_v24 = vadd.s32 (!%p362_p10), 40, %v2502_v12  ;;  %v2530_v25 = vadd.s32 (!%p362_p10), 48, %v2502_v12  ;;  %v2533_v26 = vadd.s32 (!%p362_p10), 56, %v2502_v12  ;;  %v995_v42 = vsub.s32 (!%p362_p10), 4, %v2502_v12 }
  0x1a   : > { %s2468_s29 = scalar_select %p425_p12, %s2309_s13, 1  ;;  %v1014_v45 = vsub.s32 5, %v2502_v12  ;;  %v1033_v47 = vsub.s32 6, %v2502_v12  ;;  %v1052_v49 = vsub.s32 7, %v2502_v12 }
  0x1b   : > { %s433_s12 = scalar_select %p432_p13, %s2463_s28, 7 }
  0x1c   : > { %s3119_s17 = sshll.u32 %s2468_s29, 3  ;;  %s1978_s20 = sshll.u32 %s2468_s29, 2 }
  0x1d   : > { %s2476_s18 = sadd.s32 %s3119_s17, %s433_s12  ;;  %s428_s12 = scalar_lea.vmem %s3106_s0, %s1978_s20 }
  0x1e   : > { %s1981_s21 = sshll.u32 %s2476_s18, 3  ;;  %v462_v6 = vld [vmem:[%s428_s12] sm:$0x7]  ;;  %s450_s20 = scalar_lea.vmem %s3109_s3, %s2476_s18 }
  0x1f   : > { %s437_s26 = scalar_lea.vmem %s3107_s1, %s1981_s21  ;;  %2076 = vmatpush3.msk.msra.mxu0 %vm475_vm3, %v462_v6  ;;  %v468_v13 = vld [vmem:[%s450_s20] sm:$0xf]  ;;  %s3133_s17 = sshll.u32 %s2468_s29, 3 }
  0x20   : > { %v463_v2 = vld [vmem:[%s437_s26] sm:$0xff]  ;;  %v464_v3 = vld [vmem:[%s437_s26 + $0x8] sm:$0xff]  ;;  %v465_v7 = vld [vmem:[%s437_s26 + $0x10] sm:$0xff]  ;;  %2078 = vmatmul.mubr.msk.f32.vlgmr.msra.gmra.mrb[0].mxu0 %vm471_vm1, %v470_v5  ;;  %v647_v16 = vrot.slane %v468_v13, %v2505_v14  ;;  %v651_v17 = vrot.slane %v468_v13, %v2508_v15  ;;  %v2536_v27 = vrot.slane %v468_v13, %v2516_v19  ;;  %v2544_v29 = vrot.slane %v468_v13, %v2513_v18  ;;  %s2332_s20 = smov 48   ;;  %s2334_s29 = smov 80  }
  0x21   : > { %v2092_v4 = vpack.c.bf16 %v464_v3, %v463_v2  ;;  %v466_v8 = vld [vmem:[%s437_s26 + $0x18] sm:$0xff]  ;;  %827 = vmatprep.mubr.f32.mxu0 %v2325_v1  ;;  %s442_s26 = scalar_lea.vmem %s3108_s2, %s3133_s17  ;;  %v1073_v2 = vunpack.c.0.s8 %v1072_v62  ;;  %s2333_s17 = smov 64  }
  0x22   : > { %v2096_v9 = vpack.c.bf16 %v466_v8, %v465_v7  ;;  %vm661_vm4 = vcmp.eq.s32.totalorder %v2502_v12, %v651_v17  ;;  %vm660_vm5 = vcmp.eq.s32.totalorder %v2502_v12, %v647_v16  ;;  %vm665_vm6 = vcmp.eq.s32.totalorder %v637_v20, %v651_v17  ;;  %v467_v35 = vld [vmem:[%s442_s26] sm:$0xff]  ;;  %s2933_s26 = scalar_lea.vmem [#allocation2], %s1977_s25  ;;  %s2335_s12 = smov 96  }
  0x23   : > { %2094 = vmatpush3.bf16.xpose.msk.msra.mxu1 %vm2093_vm2, %v2092_v4  ;;  %vm664_vm7 = vcmp.eq.s32.totalorder %v637_v20, %v647_v16  ;;  %vm2099_vm8 = vmpackc.low %vm665_vm6, %vm661_vm4  ;;  %vm669_vm9 = vcmp.eq.s32.totalorder %v638_v21, %v651_v17  ;;  %vm673_vm10 = vcmp.eq.s32.totalorder %v639_v22, %v651_v17  ;;  %vm668_vm11 = vcmp.eq.s32.totalorder %v638_v21, %v647_v16  ;;  %s2336_s21 = smov 112   ;;  %s1836_s25 = sshll.u32 %s2933_s26, 4  ;;  %s3048_s25 = int_to_ptr.vmem [resolvable:$true] %s1836_s25 }
  0x24   : > { %2095 = vmatprep.subr.bf16.mxu1 %v2323_v0  ;;  %vm672_vm12 = vcmp.eq.s32.totalorder %v639_v22, %v647_v16  ;;  %2100 = vmatprep.subr.msk.bf16.mxu0 %vm2099_vm8, %v2326_v28  ;;  %vm2101_vm13 = vmpackc.low %vm664_vm7, %vm660_vm5  ;;  %vm677_vm14 = vcmp.eq.s32.totalorder %v2524_v23, %v651_v17  ;;  %vm681_vm15 = vcmp.eq.s32.totalorder %v2527_v24, %v651_v17  ;;  %s2227_s15 = scalar_lea.vmem %s3048_s25, 1024 }
  0x25   : > { %2102 = vmatpush1.bf16.msk.msra.mxu0 %vm2101_vm13, %v2326_v28  ;;  %vm2103_vm0 = vmpackc.low %vm673_vm10, %vm669_vm9  ;;  %vm680_vm3 = vcmp.eq.s32.totalorder %v2527_v24, %v647_v16  ;;  %vm685_vm5 = vcmp.eq.s32.totalorder %v2530_v25, %v651_v17  ;;  %vm689_vm6 = vcmp.eq.s32.totalorder %v2533_v26, %v651_v17  ;;  %vm663_vm7 = vcmp.eq.s32.totalorder %v2502_v12, %v2536_v27  ;;  %p2228_p0 = scmp.ne.s32.totalorder %s3048_s25, %s2227_s15 }
  0x26   : > { %2104 = vmatprep.subr.msk.bf16.mxu0 %vm2103_vm0, %v2326_v28  ;;  %vm2107_vm4 = vmpackc.low %vm681_vm15, %vm677_vm14  ;;  %vm667_vm8 = vcmp.eq.s32.totalorder %v637_v20, %v2536_v27  ;;  %vm662_vm10 = vcmp.eq.s32.totalorder %v2502_v12, %v2544_v29  ;;  %vm671_vm13 = vcmp.eq.s32.totalorder %v638_v21, %v2536_v27  ;;  %vm675_vm14 = vcmp.eq.s32.totalorder %v639_v22, %v2536_v27 }
  0x27   : > { %vm684_vm15 = vcmp.eq.s32.totalorder %v2530_v25, %v647_v16  ;;  %vm688_vm0 = vcmp.eq.s32.totalorder %v2533_v26, %v647_v16  ;;  %v2675_v6 = vsub.s32 %v1073_v2, %v2502_v12  ;;  %p2229_p1 = pnand %p2228_p0, %p2441_p3 }
  0x29   : > { %p2230_p2 = pneg %p2229_p1 }
  0x2b   : > { %2098 = vmatpush3.bf16.xpose.msk.msra.mxu1 %vm2093_vm2, %v2096_v9  ;;  %vm676_vm2 = vcmp.eq.s32.totalorder %v2524_v23, %v647_v16 }
  0x2c   : > { %vm2109_vm9 = vmpackc.low %vm680_vm3, %vm676_vm2 }
  0x2d   : > { %vm2570_vm3 = vmpackc.low %vm675_vm14, %vm671_vm13 }
  0x32   : > { %2089 = vmatmul.mubr.msk.f32.vlgmr.msra.gmra.mrb[0].mxu1 %vm471_vm1, %v549_v10  ;;  %vm2105_vm1 = vmpackc.low %vm672_vm12, %vm668_vm11  ;;  %vm666_vm11 = vcmp.eq.s32.totalorder %v637_v20, %v2544_v29 }
  0x33   : > { %910 = vmatprep.mubr.f32.mxu1 %v2325_v1  ;;  %2106 = vmatpush1.bf16.msk.msra.mxu0 %vm2105_vm1, %v2326_v28  ;;  %vm2111_vm12 = vmpackc.low %vm689_vm6, %vm685_vm5  ;;  %vm674_vm5 = vcmp.eq.s32.totalorder %v639_v22, %v2544_v29 }
  0x34   : > { %2108 = vmatprep.subr.msk.bf16.mxu0 %vm2107_vm4, %v2326_v28  ;;  %vm2115_vm1 = vmpackc.low %vm667_vm8, %vm663_vm7  ;;  %vm670_vm4 = vcmp.eq.s32.totalorder %v638_v21, %v2544_v29  ;;  %vm756_vm8 = vcmask 523264  }
  0x35   : > { %vm2564_vm2 = vmpackc.low %vm666_vm11, %vm662_vm10  ;;  %2131 = vmatprep.subr.msk.bf16.mxu1 %vm2115_vm1, %v2326_v28  ;;  %vm683_vm10 = vcmp.eq.s32.totalorder %v2527_v24, %v2536_v27  ;;  %vm678_vm11 = vcmp.eq.s32.totalorder %v2524_v23, %v2544_v29 }
  0x36   : > { %2135 = vmatpush1.bf16.msk.msra.mxu1 %vm2564_vm2, %v2326_v28  ;;  %vm2113_vm6 = vmpackc.low %vm688_vm0, %vm684_vm15  ;;  %vm687_vm15 = vcmp.eq.s32.totalorder %v2530_v25, %v2536_v27  ;;  %vm691_vm0 = vcmp.eq.s32.totalorder %v2533_v26, %v2536_v27 }
  0x37   : > { %2110 = vmatpush1.bf16.msk.msra.mxu0 %vm2109_vm9, %v2326_v28  ;;  %2132 = vmatprep.subr.msk.bf16.mxu1 %vm2570_vm3, %v2326_v28  ;;  %vm2583_vm7 = vmpackc.low %vm674_vm5, %vm670_vm4  ;;  %vm679_vm9 = vcmp.eq.s32.totalorder %v2524_v23, %v2536_v27  ;;  %vm1725_vm5 = vcmask 130048  }
  0x38   : > { %2112 = vmatprep.subr.msk.bf16.mxu0 %vm2111_vm12, %v2326_v28  ;;  %vm682_vm12 = vcmp.eq.s32.totalorder %v2527_v24, %v2544_v29  ;;  %vm2123_vm13 = vmpackc.low %vm683_vm10, %vm679_vm9  ;;  %vm1732_vm9 = vcmask 654336   ;;  %vm1734_vm10 = vcmask 785408  }
  0x39   : > { %vm2125_vm14 = vmpackc.low %vm682_vm12, %vm678_vm11  ;;  %vm1736_vm11 = vcmask 916480  }
  0x3a   : > { %2136 = vmatpush1.bf16.msk.msra.mxu1 %vm2583_vm7, %v2326_v28 }
  0x3b   : > { %2114 = vmatpush1.bf16.msk.msra.mxu0 %vm2113_vm6, %v2326_v28  ;;  %2133 = vmatprep.subr.msk.bf16.mxu1 %vm2123_vm13, %v2326_v28  ;;  %vm1727_vm6 = vcmask 261120  }
  0x3c   : > { %2116 = vmatprep.subr.msk.bf16.mxu0 %vm2115_vm1, %v2326_v28  ;;  %vm686_vm1 = vcmp.eq.s32.totalorder %v2530_v25, %v2544_v29 }
  0x3e   : > { %2137 = vmatpush1.bf16.msk.msra.mxu1 %vm2125_vm14, %v2326_v28 }
  0xf3   : > { %v545_v33 = vpop.f32.mrb[0].mxu0 }
  0xf4   : > { %2042 = vmatmul.mubr.msk.f32.vlgmr.msra.gmra.mrb[2].mxu0 %vm756_vm8, %v545_v33  ;;  %v2079_v34 = vpop.f32.mrb[1].mxu0 }
  0xf5   : > { %2118 = vmatpush1.bf16.msk.msra.mxu0 %vm2564_vm2, %v2326_v28  ;;  %833 = vmatprep.mubr.f32.mxu0 %v2325_v1  ;;  %vm690_vm2 = vcmp.eq.s32.totalorder %v2533_v26, %v2544_v29 }
  0xf6   : > { %2120 = vmatprep.subr.msk.bf16.mxu0 %vm2570_vm3, %v2326_v28  ;;  %vm2127_vm3 = vmpackc.low %vm691_vm0, %vm687_vm15 }
  0xf7   : > { %2134 = vmatprep.subr.msk.bf16.mxu1 %vm2127_vm3, %v2326_v28  ;;  %vm2129_vm4 = vmpackc.low %vm690_vm2, %vm686_vm1 }
  0xf8   : > { %2043 = vmatmul.mubr.msk.f32.gmra.mrb[4].mxu0 %vm756_vm8, %v467_v35  ;;  %2138 = vmatpush1.bf16.msk.msra.mxu1 %vm2129_vm4, %v2326_v28 }
  0xf9   : > { %2122 = vmatpush1.bf16.msk.msra.mxu0 %vm2583_vm7, %v2326_v28  ;;  %904 = vmatprep.mubr.f32.mxu0 %v2325_v1  ;;  %vm1729_vm7 = vcmask 392192  }
  0xfa   : > { %2124 = vmatprep.subr.msk.bf16.mxu0 %vm2123_vm13, %v2326_v28 }
  0xfb   : > { %2061 = vmatmul.mubr.msk.f32.vlgmr.msra.gmra.mrb[2].mxu1 %vm756_vm8, %v467_v35 }
  0xfd   : > { %2126 = vmatpush1.bf16.msk.msra.mxu0 %vm2125_vm14, %v2326_v28 }
  0xfe   : > { %2128 = vmatprep.subr.msk.bf16.mxu0 %vm2127_vm3, %v2326_v28 }
 0x101   : > { %2130 = vmatpush1.bf16.msk.msra.mxu0 %vm2129_vm4, %v2326_v28 }
 0x104   : > { %2060 = vmatmul.mubr.msk.f32.vlgmr.msra.gmra.mrb[6].mxu0 %vm756_vm8, %v545_v33 }
 0x105   : > { %v631_v36 = vpop.f32.mrb[0].mxu1 }
 0x106   : > { %v2090_v37 = vpop.f32.mrb[1].mxu1  ;;  %v920_v38 = vrot.slane %v631_v36, %v2505_v14  ;;  %v939_v39 = vrot.slane %v631_v36, %v2508_v15  ;;  %v958_v40 = vrot.slane %v631_v36, %v2513_v18  ;;  %v977_v41 = vrot.slane %v631_v36, %v2516_v19 }
 0x107   : > { %v996_v43 = vrot.slane %v631_v36, %v995_v42  ;;  %v1015_v46 = vrot.slane %v631_v36, %v1014_v45  ;;  %v1034_v48 = vrot.slane %v631_v36, %v1033_v47  ;;  %v1053_v50 = vrot.slane %v631_v36, %v1052_v49 }
 0x108   : > { %930 = vbcast.lane.b32.xlu1 %v920_v38, 272  ;;  %922 = vbcast.lane.b32.xlu0 %v920_v38, 256 }
 0x10c   : > { %934 = vbcast.lane.b32.xlu1 %v920_v38, 280  ;;  %926 = vbcast.lane.b32.xlu0 %v920_v38, 264 }
 0x110   : > { %945 = vbcast.lane.b32.xlu1 %v939_v39, 264  ;;  %941 = vbcast.lane.b32.xlu0 %v939_v39, 256 }
 0x114   : > { %953 = vbcast.lane.b32.xlu1 %v939_v39, 280  ;;  %949 = vbcast.lane.b32.xlu0 %v939_v39, 272 }
 0x118   : > { %964 = vbcast.lane.b32.xlu1 %v958_v40, 264  ;;  %960 = vbcast.lane.b32.xlu0 %v958_v40, 256 }
 0x11c   : > { %972 = vbcast.lane.b32.xlu1 %v958_v40, 280  ;;  %968 = vbcast.lane.b32.xlu0 %v958_v40, 272 }
 0x120   : > { %983 = vbcast.lane.b32.xlu1 %v977_v41, 264  ;;  %979 = vbcast.lane.b32.xlu0 %v977_v41, 256 }
 0x124   : > { %991 = vbcast.lane.b32.xlu1 %v977_v41, 280  ;;  %987 = vbcast.lane.b32.xlu0 %v977_v41, 272 }
 0x128   : > { %1002 = vbcast.lane.b32.xlu1 %v996_v43, 264  ;;  %998 = vbcast.lane.b32.xlu0 %v996_v43, 256 }
 0x12c   : > { %1010 = vbcast.lane.b32.xlu1 %v996_v43, 280  ;;  %1006 = vbcast.lane.b32.xlu0 %v996_v43, 272 }
 0x130   : > { %1021 = vbcast.lane.b32.xlu1 %v1015_v46, 264  ;;  %1017 = vbcast.lane.b32.xlu0 %v1015_v46, 256 }
 0x134   : > { %1029 = vbcast.lane.b32.xlu1 %v1015_v46, 280  ;;  %1025 = vbcast.lane.b32.xlu0 %v1015_v46, 272 }
 0x138   : > { %1040 = vbcast.lane.b32.xlu1 %v1034_v48, 264  ;;  %1036 = vbcast.lane.b32.xlu0 %v1034_v48, 256 }
 0x13c   : > { %1048 = vbcast.lane.b32.xlu1 %v1034_v48, 280  ;;  %1044 = vbcast.lane.b32.xlu0 %v1034_v48, 272  ;;  %v2329_v48 = vmov 1934713408  }
 0x13d   : > { %v1136_v49 = vunpack.c.l.s4 %v2329_v48 }
 0x140   : > { %1059 = vbcast.lane.b32.xlu1 %v1053_v50, 264  ;;  %1055 = vbcast.lane.b32.xlu0 %v1053_v50, 256 }
 0x144   : > { %1067 = vbcast.lane.b32.xlu1 %v1053_v50, 280  ;;  %1063 = vbcast.lane.b32.xlu0 %v1053_v50, 272 }
 0x148   : > { %1766 = vperm.xlu0 %2226, %v1763_v51  }
 0x14c   : > { %1801 = vperm.xlu0 %2226, %v1798_v52  }
 0x17a   : > { %v2650_v53 = vpop.permute.xlu1 %930  ;;  %v2652_v54 = vpop.permute.xlu0 %922 }
 0x17e   : > { %v2654_v55 = vpop.permute.xlu1 %934  ;;  %v2656_v56 = vpop.permute.xlu0 %926 }
 0x182   : > { %v946_v57 = vpop.permute.xlu1 %945  ;;  %v942_v58 = vpop.permute.xlu0 %941 }
 0x186   : > { %v2658_v59 = vpop.permute.xlu1 %953  ;;  %v2660_v60 = vpop.permute.xlu0 %949 }
 0x18a   : > { %v2662_v63 = vpop.permute.xlu1 %964  ;;  %v2664_v0 = vpop.permute.xlu0 %960 }
 0x18b   : > { %v1206_v1 = vcombine.high %v2656_v56, %v2662_v63  ;;  %v1070_v7 = vcombine.high %v2652_v54, %v2664_v0  ;;  %v1205_v62 = vcombine.low %v2656_v56, %v2662_v63 }
 0x18d   : > { %v2680_v13 = vrot.slane %v1206_v1, %v2675_v6  ;;  %v2689_v20 = vrot.slane %v1070_v7, %v2675_v6  ;;  %v1069_v1 = vcombine.low %v2652_v54, %v2664_v0  ;;  %v2771_v0 = vrot.slane %v1205_v62, %v2675_v6 }
 0x18e   : > { %v2668_v3 = vpop.permute.xlu1 %972  ;;  %v2670_v4 = vpop.permute.xlu0 %968 }
 0x18f   : > { %v1478_v5 = vcombine.high %v2654_v55, %v2668_v3  ;;  %v1342_v25 = vcombine.high %v2650_v53, %v2670_v4 }
 0x191   : > { %v2708_v32 = vrot.slane %v1478_v5, %v2675_v6  ;;  %v2717_v35 = vrot.slane %v1342_v25, %v2675_v6  ;;  %v1137_v5 = vunpack.c.0.s8 %v1136_v49 }
 0x192   : > { %v984_v8 = vpop.permute.xlu1 %983  ;;  %v980_v9 = vpop.permute.xlu0 %979 }
 0x193   : > { %v1222_v10 = vcombine.high %v946_v57, %v984_v8  ;;  %v1086_v11 = vcombine.high %v942_v58, %v980_v9  ;;  %v1221_v50 = vcombine.low %v946_v57, %v984_v8  ;;  %v1085_v51 = vcombine.low %v942_v58, %v980_v9 }
 0x194   : > { %v2783_v48 = vsub.s32 %v1137_v5, %v2502_v12 }
 0x195   : > { %v2683_v16 = vrot.slane %v1222_v10, %v2675_v6  ;;  %v2686_v17 = vrot.slane %v1086_v11, %v2675_v6  ;;  %v2754_v7 = vrot.slane %v1221_v50, %v2675_v6  ;;  %v2757_v57 = vrot.slane %v1085_v51, %v2675_v6 }
 0x196   : > { %v992_v21 = vpop.permute.xlu1 %991  ;;  %v988_v22 = vpop.permute.xlu0 %987  ;;  %v1077_v10 = vrot.slane %v1069_v1, %v2675_v6  ;;  %v1477_v11 = vcombine.low %v2654_v55, %v2668_v3 }
 0x197   : > { %v1494_v28 = vcombine.high %v2658_v59, %v992_v21  ;;  %v1358_v29 = vcombine.high %v2660_v60, %v988_v22  ;;  %v1493_v56 = vcombine.low %v2658_v59, %v992_v21  ;;  %v1357_v25 = vcombine.low %v2660_v60, %v988_v22 }
 0x198   : > { %v1269_v49 = vcombine.low %v2771_v0, %v2754_v7  ;;  %v1133_v50 = vcombine.low %v1077_v10, %v2757_v57  ;;  %v2802_v1 = vrot.slane %v1477_v11, %v2675_v6 }
 0x199   : > { %v2711_v33 = vrot.slane %v1494_v28, %v2675_v6  ;;  %v2714_v34 = vrot.slane %v1358_v29, %v2675_v6  ;;  %v1341_v28 = vcombine.low %v2650_v53, %v2670_v4  ;;  %v2794_v53 = vrot.slane %v1493_v56, %v2675_v6 }
 0x19a   : > { %v2703_v30 = vpop.permute.xlu1 %1002  ;;  %v2705_v31 = vpop.permute.xlu0 %998  ;;  %v1365_v12 = vrot.slane %v1357_v25, %v2675_v6  ;;  %v2810_v56 = vrot.slane %v1269_v49, %v2783_v48 }
 0x19b   : > { %v1541_v25 = vcombine.low %v2802_v1, %v2794_v53 }
 0x19e   : > { %v2727_v40 = vpop.permute.xlu1 %1010  ;;  %v2729_v41 = vpop.permute.xlu0 %1006 }
 0x1a2   : > { %v2731_v42 = vpop.permute.xlu1 %1021  ;;  %v2733_v43 = vpop.permute.xlu0 %1017 }
 0x1a6   : > { %v2735_v44 = vpop.permute.xlu1 %1029  ;;  %v2737_v45 = vpop.permute.xlu0 %1025 }
 0x1aa   : > { %v2739_v46 = vpop.permute.xlu1 %1040  ;;  %v2741_v47 = vpop.permute.xlu0 %1036 }
 0x1ab   : > { %v1237_v2 = vcombine.low %v2703_v30, %v2739_v46  ;;  %v1101_v58 = vcombine.low %v2705_v31, %v2741_v47 }
 0x1ad   : > { %v1245_v59 = vrot.slane %v1237_v2, %v2675_v6  ;;  %v1109_v55 = vrot.slane %v1101_v58, %v2675_v6  ;;  %v1349_v2 = vrot.slane %v1341_v28, %v2675_v6 }
 0x1ae   : > { %v2743_v52 = vpop.permute.xlu1 %1048  ;;  %v2745_v61 = vpop.permute.xlu0 %1044 }
 0x1af   : > { %v1509_v4 = vcombine.low %v2727_v40, %v2743_v52  ;;  %v1373_v51 = vcombine.low %v2729_v41, %v2745_v61  ;;  %v1405_v49 = vcombine.low %v1349_v2, %v1365_v12 }
 0x1b1   : > { %v1517_v28 = vrot.slane %v1509_v4, %v2675_v6  ;;  %v1381_v37 = vrot.slane %v1373_v51, %v2675_v6  ;;  %v1134_v4 = vcombine.high %v1077_v10, %v2757_v57  ;;  %v2839_v26 = vrot.slane %v1405_v49, %v2783_v48 }
 0x1b2   : > { %v2761_v8 = vpop.permute.xlu1 %1059  ;;  %v2763_v9 = vpop.permute.xlu0 %1055  ;;  %v1270_v57 = vcombine.high %v2771_v0, %v2754_v7 }
 0x1b3   : > { %v1253_v54 = vcombine.low %v2731_v42, %v2761_v8  ;;  %v1117_v63 = vcombine.low %v2733_v43, %v2763_v9 }
 0x1b5   : > { %v1261_v21 = vrot.slane %v1253_v54, %v2675_v6  ;;  %v1125_v29 = vrot.slane %v1117_v63, %v2675_v6  ;;  %v2816_v63 = vrot.slane %v1133_v50, %v2783_v48 }
 0x1b6   : > { %v2789_v60 = vpop.permute.xlu1 %1067  ;;  %v2791_v3 = vpop.permute.xlu0 %1063 }
 0x1b7   : > { %v1301_v22 = vcombine.low %v1245_v59, %v1261_v21  ;;  %v1165_v62 = vcombine.low %v1109_v55, %v1125_v29  ;;  %v1525_v5 = vcombine.low %v2735_v44, %v2789_v60  ;;  %v1389_v58 = vcombine.low %v2737_v45, %v2791_v3 }
 0x1b8   : > { %v1302_v38 = vcombine.high %v1245_v59, %v1261_v21  ;;  %v1148_v21 = vrot.slane %v1134_v4, %v2783_v48 }
 0x1b9   : > { %v2813_v54 = vrot.slane %v1301_v22, %v2783_v48  ;;  %v2819_v11 = vrot.slane %v1165_v62, %v2783_v48  ;;  %v1533_v39 = vrot.slane %v1525_v5, %v2675_v6  ;;  %v1397_v27 = vrot.slane %v1389_v58, %v2675_v6 }
 0x1ba   : > { %v1166_v62 = vcombine.high %v1109_v55, %v1125_v29  ;;  %v2833_v5 = vrot.slane %v1541_v25, %v2783_v48  ;;  %v1406_v58 = vcombine.high %v1349_v2, %v1365_v12  ;;  %v1316_v7 = vrot.slane %v1302_v38, %v2783_v48 }
 0x1bb   : > { %v1334_v22 = vcombine.high %v2810_v56, %v2813_v54  ;;  %v1198_v50 = vcombine.high %v2816_v63, %v2819_v11  ;;  %v1573_v24 = vcombine.low %v1517_v28, %v1533_v39  ;;  %v1437_v36 = vcombine.low %v1381_v37, %v1397_v27 }
 0x1bc   : > { %v1438_v23 = vcombine.high %v1381_v37, %v1397_v27  ;;  %v1180_v37 = vrot.slane %v1166_v62, %v2783_v48  ;;  %v1574_v55 = vcombine.high %v1517_v28, %v1533_v39  ;;  %v1420_v12 = vrot.slane %v1406_v58, %v2783_v48 }
 0x1bd   : > { %1642 = vrot.lane.b32.xlu1 %v1334_v22, %s2330_s14  ;;  %1614 = vrot.lane.b32.xlu0 %v1198_v50, %s2330_s14  ;;  %v2836_v51 = vrot.slane %v1573_v24, %v2783_v48  ;;  %v2842_v29 = vrot.slane %v1437_v36, %v2783_v48  ;;  %v1118_v24 = vcombine.high %v2733_v43, %v2763_v9 }
 0x1be   : > { %v1452_v59 = vrot.slane %v1438_v23, %v2783_v48  ;;  %v1102_v36 = vcombine.high %v2705_v31, %v2741_v47  ;;  %v1199_v0 = vcombine.low %v1148_v21, %v1180_v37  ;;  %v1390_v9 = vcombine.high %v2737_v45, %v2791_v3 }
 0x1bf   : > { %v1606_v27 = vcombine.high %v2833_v5, %v2836_v51  ;;  %v1470_v10 = vcombine.high %v2839_v26, %v2842_v29  ;;  %v2860_v43 = vrot.slane %v1118_v24, %v2675_v6  ;;  %v1284_v2 = vrot.slane %v1270_v57, %v2783_v48 }
 0x1c0   : > { %v1471_v23 = vcombine.low %v1420_v12, %v1452_v59  ;;  %v1542_v31 = vcombine.high %v2802_v1, %v2794_v53  ;;  %v2868_v39 = vrot.slane %v1102_v36, %v2675_v6  ;;  %v1374_v38 = vcombine.high %v2729_v41, %v2745_v61 }
 0x1c1   : > { %1698 = vrot.lane.b32.xlu1 %v1606_v27, %s2330_s14  ;;  %1670 = vrot.lane.b32.xlu0 %v1470_v10, %s2330_s14  ;;  %v1254_v47 = vcombine.high %v2731_v42, %v2761_v8  ;;  %v1335_v45 = vcombine.low %v1284_v2, %v1316_v7  ;;  %v1588_v3 = vrot.slane %v1574_v55, %v2783_v48  ;;  %s2337_s14 = smov [#allocation2]  }
 0x1c2   : > { %v1333_v53 = vcombine.low %v2810_v56, %v2813_v54  ;;  %v1197_v1 = vcombine.low %v2816_v63, %v2819_v11  ;;  %v1605_v25 = vcombine.low %v2833_v5, %v2836_v51  ;;  %v1469_v41 = vcombine.low %v2839_v26, %v2842_v29 }
 0x1c3   : > { %v1181_v42 = vcombine.low %v2868_v39, %v2860_v43  ;;  %v2888_v61 = vrot.slane %v1390_v9, %v2675_v6  ;;  %v1200_v8 = vcombine.high %v1148_v21, %v1180_v37  ;;  %v1238_v28 = vcombine.high %v2703_v30, %v2739_v46 }
 0x1c4   : > { %v1556_v49 = vrot.slane %v1542_v31, %v2783_v48  ;;  %v2895_v22 = vrot.slane %v1374_v38, %v2675_v6  ;;  %v1268_v50 = vrot.slane %v1254_v47, %v2675_v6  ;;  %v1526_v62 = vcombine.high %v2735_v44, %v2789_v60 }
 0x1c5   : > { %1618 = vrot.lane.b32.xlu1 %v1199_v0, %s2331_s19  ;;  %1674 = vrot.lane.b32.xlu0 %v1471_v23, %s2331_s19  ;;  %v1472_v27 = vcombine.high %v1420_v12, %v1452_v59  ;;  %v1189_v30 = vrot.slane %v1181_v42, %v2783_v48  ;;  %v1252_v46 = vrot.slane %v1238_v28, %v2675_v6 }
 0x1c6   : > { %v1607_v4 = vcombine.low %v1556_v49, %v1588_v3  ;;  %v1453_v58 = vcombine.low %v2895_v22, %v2888_v61  ;;  %v1510_v37 = vcombine.high %v2727_v40, %v2743_v52  ;;  %v3134_v57 = vcombine.low %v2689_v20, %v2686_v17 }
 0x1c7   : > { %v1317_v60 = vcombine.low %v1252_v46, %v1268_v50  ;;  %v1540_v24 = vrot.slane %v1526_v62, %v2675_v6  ;;  %v1336_v10 = vcombine.high %v1284_v2, %v1316_v7  ;;  %v3135_v40 = vcombine.low %v2717_v35, %v2714_v34  ;;  %v2924_v23 = vpop.f32.mrb[2].mxu0 }
 0x1c8   : > { %v1157_v44 = vrot.slane %v3134_v57, %v2783_v48  ;;  %v1461_v36 = vrot.slane %v1453_v58, %v2783_v48  ;;  %v1524_v21 = vrot.slane %v1510_v37, %v2675_v6  ;;  %v1608_v12 = vcombine.high %v1556_v49, %v1588_v3  ;;  %v2928_v2 = vpop.f32.mrb[3].mxu0 }
 0x1c9   : > { %1646 = vrot.lane.b32.xlu1 %v1335_v45, %s2331_s19  ;;  %1622 = vrot.lane.b32.xlu0 %v1200_v8, %s2332_s20  ;;  %v1429_v52 = vrot.slane %v3135_v40, %v2783_v48  ;;  %v1325_v0 = vrot.slane %v1317_v60, %v2783_v48  ;;  %v3136_v9 = vcombine.low %v2680_v13, %v2683_v16 }
 0x1ca   : > { %v1201_v59 = vcombine.low %v1157_v44, %v1189_v30  ;;  %v1589_v55 = vcombine.low %v1524_v21, %v1540_v24  ;;  %v1318_v45 = vcombine.high %v1252_v46, %v1268_v50  ;;  %v1202_v3 = vcombine.high %v1157_v44, %v1189_v30 }
 0x1cb   : > { %v1473_v7 = vcombine.low %v1429_v52, %v1461_v36  ;;  %v1293_v6 = vrot.slane %v3136_v9, %v2783_v48  ;;  %v835_v47 = vpop.f32.mrb[4].mxu0  ;;  %v3137_v8 = vcombine.low %v2708_v32, %v2711_v33  ;;  %v1474_v58 = vcombine.high %v1429_v52, %v1461_v36 }
 0x1cc   : > { %v1597_v38 = vrot.slane %v1589_v55, %v2783_v48  ;;  %1816 = vst [vmem:[%s2933_s26 + $0x20] sm:$0xff] %v835_v47  ;;  %v837_v42 = vpop.f32.mrb[5].mxu0  ;;  %v3138_v30 = vcombine.high %v2680_v13, %v2683_v16  ;;  %v1182_v37 = vcombine.high %v2868_v39, %v2860_v43  ;;  %v3140_v43 = vcombine.high %v2689_v20, %v2686_v17 }
 0x1cd   : > { %1702 = vrot.lane.b32.xlu1 %v1607_v4, %s2331_s19  ;;  %1678 = vrot.lane.b32.xlu0 %v1472_v27, %s2332_s20  ;;  %v1337_v31 = vcombine.low %v1293_v6, %v1325_v0  ;;  %v1565_v28 = vrot.slane %v3137_v8, %v2783_v48  ;;  %1817 = vst [vmem:[%s2933_s26 + $0x28] sm:$0xff] %v837_v42 }
 0x1ce   : > { %v1590_v4 = vcombine.high %v1524_v21, %v1540_v24  ;;  %v1332_v27 = vrot.slane %v1318_v45, %v2783_v48  ;;  %v1300_v46 = vrot.slane %v3138_v30, %v2783_v48  ;;  %v1338_v57 = vcombine.high %v1293_v6, %v1325_v0  ;;  %v912_v20 = vpop.f32.mrb[2].mxu1  ;;  %v2973_v0 = vpop.permute.xlu0 %1766 }
 0x1cf   : > { %v1609_v50 = vcombine.low %v1565_v28, %v1597_v38  ;;  %v3139_v24 = vcombine.high %v2708_v32, %v2711_v33  ;;  %v1610_v13 = vcombine.high %v1565_v28, %v1597_v38  ;;  %v1196_v16 = vrot.slane %v1182_v37, %v2783_v48  ;;  %1818 = vst [vmem:[%s2933_s26 + $0x30] sm:$0xff] %v912_v20  ;;  %v914_v55 = vpop.f32.mrb[3].mxu1 }
 0x1d0   : > { %v1339_v44 = vcombine.low %v1300_v46, %v1332_v27  ;;  %v1604_v60 = vrot.slane %v1590_v4, %v2783_v48  ;;  %v1164_v39 = vrot.slane %v3140_v43, %v2783_v48  ;;  %v1340_v32 = vcombine.high %v1300_v46, %v1332_v27  ;;  %1819 = vst [vmem:[%s2933_s26 + $0x38] sm:$0xff] %v914_v55 }
 0x1d1   : > { %1650 = vrot.lane.b32.xlu1 %v1336_v10, %s2332_s20  ;;  %1626 = vrot.lane.b32.xlu0 %v1201_v59, %s2333_s17  ;;  %v1572_v10 = vrot.slane %v3139_v24, %v2783_v48  ;;  %v1454_v59 = vcombine.high %v2895_v22, %v2888_v61  ;;  %v3141_v33 = vcombine.high %v2717_v35, %v2714_v34 }
 0x1d2   : > { %v1203_v21 = vcombine.low %v1164_v39, %v1196_v16  ;;  %v1204_v17 = vcombine.high %v1164_v39, %v1196_v16 }
 0x1d3   : > { %v1611_v36 = vcombine.low %v1572_v10, %v1604_v60  ;;  %v1468_v40 = vrot.slane %v1454_v59, %v2783_v48  ;;  %v1436_v61 = vrot.slane %v3141_v33, %v2783_v48  ;;  %v1612_v52 = vcombine.high %v1572_v10, %v1604_v60 }
 0x1d5   : > { %1706 = vrot.lane.b32.xlu1 %v1608_v12, %s2332_s20  ;;  %1682 = vrot.lane.b32.xlu0 %v1473_v7, %s2333_s17  ;;  %v1475_v22 = vcombine.low %v1436_v61, %v1468_v40  ;;  %v1476_v12 = vcombine.high %v1436_v61, %v1468_v40  ;;  %v2975_v7 = vpop.permute.xlu0 %1801  ;;  %s459_s20 = scalar_lea.vmem %s3110_s4, %s2476_s18  ;;  %s2064_s18 = sshll.u32 %s2309_s13, 4 }
 0x1d6   : > { %v469_v60 = vld [vmem:[%s459_s20] sm:$0xf]  ;;  %s1833_s13 = sadd.s32 %s2064_s18, %s2463_s28  ;;  %s2231_s20 = sshll.u32 %s2337_s14, 4  ;;  %s2232_s20 = int_to_ptr.vmem [resolvable:$false] %s2231_s20 }
 0x1d7   : > { %v2942_v49 = vpop.f32.mrb[6].mxu0  ;;  %v1777_v54 = vrot.slane %v469_v60, %v2508_v15  ;;  %v1785_v5 = vrot.slane %v469_v60, %v2516_v19  ;;  %v1773_v55 = vrot.slane %v469_v60, %v2505_v14  ;;  %s2233_s18 = scalar_lea.vmem %s2232_s20, 2048  ;;  %p2234_p4 = scmp.lt.s32.totalorder %s3048_s25, %s2232_s20 }
 0x1d8   : > { %v2944_v62 = vpop.f32.mrb[7].mxu0  ;;  %p2235_p5 = scmp.lt.s32.totalorder %s2233_s18, %s2227_s15 }
 0x1d9   : > { %1654 = vrot.lane.b32.xlu1 %v1337_v31, %s2333_s17  ;;  %1630 = vrot.lane.b32.xlu0 %v1202_v3, %s2334_s29 }
 0x1da   : > { %p2236_p6 = por %p2235_p5, %p2234_p4 }
 0x1dc   : > { %p2237_p7 = pnand %p2236_p6, %p2230_p2 }
 0x1dd   : > { %1710 = vrot.lane.b32.xlu1 %v1609_v50, %s2333_s17  ;;  %1686 = vrot.lane.b32.xlu0 %v1474_v58, %s2334_s29  ;;  %s2065_s17 = sshll.u32 %s1833_s13, 7 }
 0x1e1   : > { %1658 = vrot.lane.b32.xlu1 %v1338_v57, %s2334_s29  ;;  %1662 = vrot.lane.b32.xlu0 %v1339_v44, %s2335_s12 }
 0x1e5   : > { %1714 = vrot.lane.b32.xlu1 %v1610_v13, %s2334_s29  ;;  %1718 = vrot.lane.b32.xlu0 %v1611_v36, %s2335_s12 }
 0x1e9   : > { %1634 = vrot.lane.b32.xlu1 %v1203_v21, %s2335_s12  ;;  %1666 = vrot.lane.b32.xlu0 %v1340_v32, %s2336_s21  ;;  %v1791_v32 = vmul.f32 %v1777_v54, %v2973_v0 }
 0x1ed   : > { %1690 = vrot.lane.b32.xlu1 %v1475_v22, %s2335_s12  ;;  %1722 = vrot.lane.b32.xlu0 %v1612_v52, %s2336_s21  ;;  %s3044_s12 = scalar_lea.hbm %s3115_s9, %s2065_s17 }
 0x1f1   : > { %1638 = vrot.lane.b32.xlu1 %v1204_v17, %s2336_s21 }
 0x1f5   : > { %1694 = vrot.lane.b32.xlu1 %v1476_v12, %s2336_s21  ;;  %v1793_v12 = vmul.f32 %v1785_v5, %v2973_v0  ;;  %s3053_s21 = scalar_lea.sflag [#allocation3], %s422_s24 }
 0x22f   : > { %v1643_v34 = vpop.permute.xlu1 %1642  ;;  %v1615_v35 = vpop.permute.xlu0 %1614 }
 0x230   : > { %v1738_v57 = vsel %vm1725_vm5, %v1333_v53, %v1643_v34  ;;  %v1726_v15 = vsel %vm1725_vm5, %v1197_v1, %v1615_v35 }
 0x233   : > { %v1699_v48 = vpop.permute.xlu1 %1698  ;;  %v1671_v9 = vpop.permute.xlu0 %1670 }
 0x234   : > { %v1752_v16 = vsel %vm1725_vm5, %v1605_v25, %v1699_v48  ;;  %v1745_v1 = vsel %vm1725_vm5, %v1469_v41, %v1671_v9  ;;  %v1781_v41 = vrot.slane %v469_v60, %v2513_v18  ;;  %v1790_v9 = vmul.f32 %v1773_v55, %v2973_v0 }
 0x237   : > { %v1619_v6 = vpop.permute.xlu1 %1618  ;;  %v1675_v31 = vpop.permute.xlu0 %1674 }
 0x238   : > { %v1728_v61 = vsel %vm1727_vm6, %v1726_v15, %v1619_v6  ;;  %v1746_v14 = vsel %vm1727_vm6, %v1745_v1, %v1675_v31 }
 0x23b   : > { %v1647_v38 = vpop.permute.xlu1 %1646  ;;  %v1623_v47 = vpop.permute.xlu0 %1622 }
 0x23c   : > { %v1739_v44 = vsel %vm1727_vm6, %v1738_v57, %v1647_v38  ;;  %v1730_v52 = vsel %vm1729_vm7, %v1728_v61, %v1623_v47 }
 0x23f   : > { %v1703_v45 = vpop.permute.xlu1 %1702  ;;  %v1679_v3 = vpop.permute.xlu0 %1678 }
 0x240   : > { %v1753_v53 = vsel %vm1727_vm6, %v1752_v16, %v1703_v45  ;;  %v1747_v38 = vsel %vm1729_vm7, %v1746_v14, %v1679_v3 }
 0x243   : > { %v1651_v42 = vpop.permute.xlu1 %1650  ;;  %v1627_v8 = vpop.permute.xlu0 %1626 }
 0x244   : > { %v1740_v24 = vsel %vm1729_vm7, %v1739_v44, %v1651_v42  ;;  %v1731_v63 = vsel %vm756_vm8, %v1730_v52, %v1627_v8 }
 0x247   : > { %v1707_v28 = vpop.permute.xlu1 %1706  ;;  %v1683_v50 = vpop.permute.xlu0 %1682 }
 0x248   : > { %v1754_v36 = vsel %vm1729_vm7, %v1753_v53, %v1707_v28 }
 0x24b   : > { %v1655_v4 = vpop.permute.xlu1 %1654  ;;  %v1631_v58 = vpop.permute.xlu0 %1630 }
 0x24c   : > { %v1741_v59 = vsel %vm756_vm8, %v1740_v24, %v1655_v4 }
 0x24f   : > { %v1711_v27 = vpop.permute.xlu1 %1710  ;;  %v1687_v30 = vpop.permute.xlu0 %1686 }
 0x250   : > { %v1755_v39 = vsel %vm756_vm8, %v1754_v36, %v1711_v27 }
 0x253   : > { %v1659_v46 = vpop.permute.xlu1 %1658  ;;  %v1663_v37 = vpop.permute.xlu0 %1662 }
 0x254   : > { %v1742_v56 = vsel %vm1732_vm9, %v1741_v59, %v1659_v46 }
 0x255   : > { %v1743_v21 = vsel %vm1734_vm10, %v1742_v56, %v1663_v37 }
 0x257   : > { %v1715_v10 = vpop.permute.xlu1 %1714  ;;  %v1719_v13 = vpop.permute.xlu0 %1718 }
 0x258   : > { %v1756_v51 = vsel %vm1732_vm9, %v1755_v39, %v1715_v10 }
 0x259   : > { %v1757_v19 = vsel %vm1734_vm10, %v1756_v51, %v1719_v13 }
 0x25b   : > { %v1635_v43 = vpop.permute.xlu1 %1634  ;;  %v1667_v40 = vpop.permute.xlu0 %1666 }
 0x25c   : > { %v1744_v25 = vsel %vm1736_vm11, %v1743_v21, %v1667_v40 }
 0x25d   : > { %v1760_v33 = vadd.f32 %v1744_v25, %v2928_v2  ;;  %v1733_v2 = vsel %vm1732_vm9, %v1731_v63, %v1631_v58 }
 0x25e   : > { %v1735_v48 = vsel %vm1734_vm10, %v1733_v2, %v1635_v43 }
 0x25f   : > { %v1691_v22 = vpop.permute.xlu1 %1690  ;;  %v1795_v17 = vadd.f32 %v1791_v32, %v1760_v33  ;;  %v1723_v20 = vpop.permute.xlu0 %1722 }
 0x260   : > { %v1758_v11 = vsel %vm1736_vm11, %v1757_v19, %v1723_v20 }
 0x261   : > { %v1805_v34 = vadd.f32 %v2975_v7, %v1795_v17  ;;  %v1762_v35 = vadd.f32 %v1758_v11, %v2944_v62  ;;  %v1748_v62 = vsel %vm756_vm8, %v1747_v38, %v1683_v50  ;;  %v1792_v50 = vmul.f32 %v1781_v41, %v2973_v0 }
 0x262   : > { %v1749_v45 = vsel %vm1732_vm9, %v1748_v62, %v1687_v30 }
 0x263   : > { %v1639_v6 = vpop.permute.xlu1 %1638  ;;  %v1809_v47 = vmax.f32 %v1805_v34, 0.0  ;;  %v1797_v26 = vadd.f32 %v1793_v12, %v1762_v35  ;;  %v1750_v3 = vsel %vm1734_vm10, %v1749_v45, %v1691_v22 }
 0x264   : > { %v1737_v29 = vsel %vm1736_vm11, %v1735_v48, %v1639_v6 }
 0x265   : > { %v1759_v31 = vadd.f32 %v1737_v29, %v2924_v23  ;;  %1813 = vst [vmem:[%s2933_s26 + $0x8] sm:$0xff] %v1809_v47  ;;  %v1807_v42 = vadd.f32 %v2975_v7, %v1797_v26 }
 0x267   : > { %v1794_v8 = vadd.f32 %v1790_v9, %v1759_v31  ;;  %v1695_v28 = vpop.permute.xlu1 %1694  ;;  %v1811_v18 = vmax.f32 %v1807_v42, 0.0 }
 0x268   : > { %v1751_v4 = vsel %vm1736_vm11, %v1750_v3, %v1695_v28 }
 0x269   : > { %v1804_v23 = vadd.f32 %v2975_v7, %v1794_v8  ;;  %v1761_v58 = vadd.f32 %v1751_v4, %v2942_v49  ;;  %1815 = vst [vmem:[%s2933_s26 + $0x18] sm:$0xff] %v1811_v18 }
 0x26b   : > { %v1808_v27 = vmax.f32 %v1804_v23, 0.0  ;;  %v1796_v30 = vadd.f32 %v1792_v50, %v1761_v58 }
 0x26d   : > { %1812 = vst [vmem:[%s2933_s26] sm:$0xff] %v1808_v27  ;;  %v1806_v46 = vadd.f32 %v2975_v7, %v1796_v30 }
 0x26f   : > { %v1810_v0 = vmax.f32 %v1806_v46, 0.0 }
 0x271   : > { %1814 = vst [vmem:[%s2933_s26 + $0x10] sm:$0xff] %v1810_v0 }
 0x272   : > { %2240 = shalt.err (!%p2237_p7)
}
 0x273   : > { %s2241_s24 = scalar_lea.hbm %s3044_s12, 1024  ;;  %s2245_s17 = scalar_lea.hbm %s3115_s9, 4096 }
 0x274   : > { %p2242_p9 = scmp.ne.s32.totalorder %s3044_s12, %s2241_s24  ;;  %p2246_p12 = scmp.lt.u32.totalorder %s3044_s12, %s3115_s9 }
 0x275   : > { %p2247_p13 = scmp.lt.u32.totalorder %s2245_s17, %s2241_s24  ;;  %p2249_p1 = scmp.lt.u32.totalorder %s2241_s24, %s3044_s12 }
 0x276   : > { %p2243_p10 = pnand %p2242_p9, %p2441_p3 }
 0x277   : > { %p2248_p0 = por %p2247_p13, %p2246_p12 }
 0x278   : > { %p2244_p11 = pneg %p2243_p10 }
 0x279   : > { %p2250_p2 = por %p2249_p1, %p2248_p0 }
 0x27b   : > { %p2251_p4 = pnand %p2250_p2, %p2244_p11 }
 0x27d   : > { %2254 = shalt.err (!%p2251_p4)
}
 0x27e   : > { %s2338_s15 = smov 512   ;;  %s2339_s14 = smov 1024  }
 0x27f   : > { %2139 = dma.vmem_to_hbm [thread:$0]  (%p2441_p3), %s3048_s25, 1024, %s3044_s12, %s3053_s21, %s2338_s15, %s2339_s14, %s2331_s19  }
 0x280 PF: > { %p2145_p5 = scmp.ge.s32.totalorder %s2321_s16, 2  ;;  %s1851_s20 = sand.u32 1, %s2293_s30  }
 0x281   : > { %s1852_s18 = scalar_lea.sflag [#allocation3], %s1851_s20 }
 0x282   : > { %p2142_p6 = pnand %p2145_p5, %p2450_p8 }
 0x284   : > { %2288 = dma.done.wait (!%p2142_p6), %s1852_s18, 1024  }
 0x285   : > { %2290 = vsyncadd (!%p2142_p6), %s1852_s18, 4294966272  ;;  %s22_s16 = sadd.s32 1, %s2321_s16   ;;  %s3142_s12 = sld [smem:[#allocation5_spill]] }
 0x286   : > { %p19_p7 = scmp.ge.s32.totalorder %s22_s16, 6   ;;  %s3143_s13 = sld [smem:[#allocation6_spill]] }
 0x287   : > { %s3144_s14 = sld [smem:[#allocation7_spill]]  ;;  %s3145_s15 = sld [smem:[#allocation8_spill]] }
 0x288   : > { %s3146_s30 = smov %s2297_s10  ;;  %s3147_s10 = smov %s2301_s11 }
 0x289   : > { %s3148_s11 = smov %s2459_s27  ;;  %21 = sbr.rel (!%p19_p7) target bundleno = 5 (0x5), region = 103 }
 0x290   :  { %1857 = vsyncpa [#allocation3], 1 }
 0x291   :  { %1859 = vsyncpa [#allocation3 + $0x1], 1 }

</bundles_post_ra>
